<compile_context>
chip_gen: v7x
topology: tpu7x:2x2x1
jax: 0.10.0
libtpu: 0.0.40
codegen_flags: <defaults>
</compile_context>

<pallas_src>
import functools

import jax
import jax.numpy as jnp
from jax.experimental import pallas as pl
from jax.experimental.pallas import tpu as pltpu

_LANE = 128


# ---------------------------------------------------------------------------
# Per-generation tiling knobs (derived once from the attached TPU)
# ---------------------------------------------------------------------------
def _query_vmem_capacity_bytes():
    try:
        return int(pltpu.get_tpu_info().vmem_capacity_bytes)
    except Exception:
        return 64 * 1024 * 1024  # conservative: v7x per-TC VMEM


_VMEM_CAPACITY = _query_vmem_capacity_bytes()
# Usable scoped-VMEM budget: leave headroom, cap well below physical.
_VMEM_BUDGET = int(min(_VMEM_CAPACITY - 16 * 1024 * 1024, 100 * 1024 * 1024))
# Max batch tile: big tiles on 128 MiB parts (v5e/v6e), smaller on v7x (64 MiB).
_TB_MAX = 1024 if _VMEM_CAPACITY >= 100 * 1024 * 1024 else 512


# ---------------------------------------------------------------------------
# Pallas kernel: one lane-dense linear layer, batch-tiled
# ---------------------------------------------------------------------------
def _linear_kernel(x_ref, w_ref, b_ref, out_ref):
    """out = x @ w + b. x tile is f32 in VMEM; cast to bf16 on the VPU
    (plenty of slack) so the wrapper never materializes a bf16 copy in HBM."""
    out_ref[...] = (
        jnp.dot(x_ref[...].astype(jnp.bfloat16), w_ref[...],
                preferred_element_type=jnp.float32)
        + b_ref[...]
    )


# ---------------------------------------------------------------------------
# Helpers
# ---------------------------------------------------------------------------
def _round_up(n, m):
    return ((n + m - 1) // m) * m


def _pad_last(a, n_pad):
    n = a.shape[-1]
    if n == n_pad:
        return a
    return jnp.pad(a, [(0, 0)] * (a.ndim - 1) + [(0, n_pad - n)])


def _vmem_need(tb, d, n_pad):
    # Double-buffered x (f32) + out (f32) tiles, and (conservatively) the
    # constant-index weight/bias inputs are also double-buffered by Pallas.
    return (2 * (tb * d * 4 + tb * n_pad * 4)
            + 2 * (d * n_pad * 2 + n_pad * 4))


def _choose_batch_tile(b, d, n_pad):
    """Pick the batch tile: >=2 grid steps when possible (megacore on v7x),
    capped at _TB_MAX, shrunk until the working set fits the VMEM budget."""
    if b < 16:
        return b  # single block; block dim == full array dim is always legal
    tb = min(_TB_MAX, _round_up(pl.cdiv(b, 2), 8))
    # TODO(synk): add a K(=D)-tiled path for very large feature dims; for
    # CIFAR-scale D, shrinking the batch tile is sufficient.
    while tb > 8 and _vmem_need(tb, d, n_pad) > _VMEM_BUDGET:
        tb = max(8, _round_up(tb // 2, 8))
    return tb


def _linear_pallas(x_flat, w_p, b_p, n_true):
    """(B, D) f32 @ (D, n_pad) bf16 + (1, n_pad) f32 -> (B, n_true) f32.

    w_p / b_p are already lane-dense padded (n_pad multiple of 128) and in
    their final dtypes (see prepare_params)."""
    B, D = x_flat.shape
    n_pad = w_p.shape[1]

    tb = _choose_batch_tile(B, D, n_pad)
    num_steps = pl.cdiv(B, tb)
    grid = (num_steps,)

    flops = 2 * num_steps * tb * D * n_pad
    bytes_accessed = B * D * 4 + D * n_pad * 2 + n_pad * 4 + B * n_pad * 4
    vmem_limit = int(min(max(_vmem_need(tb, D, n_pad) + 4 * 1024 * 1024,
                             32 * 1024 * 1024),
                         _VMEM_BUDGET))

    out = pl.pallas_call(
        _linear_kernel,
        grid=grid,
        in_specs=[
            pl.BlockSpec((tb, D), lambda i: (i, 0)),      # x: tiled along batch
            pl.BlockSpec((D, n_pad), lambda i: (0, 0)),   # w: resident
            pl.BlockSpec((1, n_pad), lambda i: (0, 0)),   # b: resident
        ],
        out_specs=pl.BlockSpec((tb, n_pad), lambda i: (i, 0)),
        out_shape=jax.ShapeDtypeStruct((B, n_pad), jnp.float32),
        compiler_params=pltpu.CompilerParams(
            dimension_semantics=("parallel",),  # v7x: batch tiles over 2 TCs
            vmem_limit_bytes=vmem_limit,
        ),
        cost_estimate=pl.CostEstimate(
            flops=flops, transcendentals=0, bytes_accessed=bytes_accessed
        ),
    )(x_flat, w_p, b_p)

    return out[:, :n_true]


# ---------------------------------------------------------------------------
# Parameter preparation (runs once, outside the per-call hot path)
# ---------------------------------------------------------------------------
def prepare_params(params):
    """Hoisted preprocessing: lane-dense padding, bf16 weight cast, and the
    algebraic fold of the trigger path into a single matmul:
        (x @ Wb + bb) @ Wfc + bfc == x @ (Wb @ Wfc) + (bb @ Wfc + bfc)."""
    wb, bb, wfc, bfc = params["wb"], params["bb"], params["wfc"], params["bfc"]
    nc_pad = _round_up(wb.shape[1], _LANE)
    wm_pad = _round_up(wfc.shape[1], _LANE)
    w_fused = jnp.dot(wb, wfc, preferred_element_type=jnp.float32)
    b_fused = jnp.dot(bb, wfc, preferred_element_type=jnp.float32) + bfc
    return {
        "w_base": _pad_last(wb, nc_pad).astype(jnp.bfloat16),
        "b_base": _pad_last(bb, nc_pad).astype(jnp.float32),
        "w_fused": _pad_last(w_fused, wm_pad).astype(jnp.bfloat16),
        "b_fused": _pad_last(b_fused, wm_pad).astype(jnp.float32),
    }


# ---------------------------------------------------------------------------
# WatermarkModule.forward equivalent
# ---------------------------------------------------------------------------
@functools.partial(jax.jit,
                   static_argnames=("trigger", "num_classes", "wm_size"))
def watermark_forward(x, prepared, *, trigger=False, num_classes=10,
                      wm_size=128):
    """x: (B, C, H, W) NCHW. Returns (B, 10) if not trigger else (B, wm_size)."""
    B = x.shape[0]
    x_flat = x.reshape(B, -1).astype(jnp.float32)
    if trigger:
        return _linear_pallas(x_flat, prepared["w_fused"], prepared["b_fused"],
                              wm_size)
    return _linear_pallas(x_flat, prepared["w_base"], prepared["b_base"],
                          num_classes)


def init_params(key, in_features, num_classes=10, wm_size=128):
    """Deterministic synthetic parameters (PyTorch Linear-style uniform init)."""
    k1, k2, k3, k4 = jax.random.split(key, 4)
    lim_b = 1.0 / jnp.sqrt(in_features)
    lim_f = 1.0 / jnp.sqrt(num_classes)
    return {
        # stored transposed vs. torch (in, out) so the kernel does x @ W
        "wb": jax.random.uniform(k1, (in_features, num_classes),
                                 jnp.float32, -lim_b, lim_b),
        "bb": jax.random.uniform(k2, (1, num_classes),
                                 jnp.float32, -lim_b, lim_b),
        "wfc": jax.random.uniform(k3, (num_classes, wm_size),
                                  jnp.float32, -lim_f, lim_f),
        "bfc": jax.random.uniform(k4, (1, wm_size),
                                  jnp.float32, -lim_f, lim_f),
    }


if __name__ == "__main__":
    key = jax.random.PRNGKey(0)
    kx, kp, kx2 = jax.random.split(key, 3)

    # Small CIFAR-like input: batch=2, channels=3, spatial=16x16 (NCHW).
    B, C, H, W = 2, 3, 16, 16
    D = C * H * W
    wm_size = 128
    x = jax.random.normal(kx, (B, C, H, W), jnp.float32)
    params = init_params(kp, in_features=D, num_classes=10, wm_size=wm_size)
    prepared = prepare_params(params)

    # trigger=False -> plain logits (B, 10)
    logits = jax.block_until_ready(
        watermark_forward(x, prepared, trigger=False, wm_size=wm_size))
    assert logits.shape == (B, 10), logits.shape

    # trigger=True -> watermark hidden vector (B, wm_size)
    wm_out = jax.block_until_ready(
        watermark_forward(x, prepared, trigger=True, wm_size=wm_size))
    assert wm_out.shape == (B, wm_size), wm_out.shape

    # --- correctness checks -------------------------------------------------
    x_flat = x.reshape(B, -1)
    xb = x_flat.astype(jnp.bfloat16)

    # Exact-math reference (same bf16 operands / f32 accumulation as kernel).
    ref_logits_bf = (jnp.dot(xb, params["wb"].astype(jnp.bfloat16),
                             preferred_element_type=jnp.float32)
                     + params["bb"])
    w_fused = params["wb"] @ params["wfc"]
    b_fused = params["bb"] @ params["wfc"] + params["bfc"]
    ref_wm_bf = (jnp.dot(xb, w_fused.astype(jnp.bfloat16),
                         preferred_element_type=jnp.float32) + b_fused)
    assert jnp.allclose(logits, ref_logits_bf, atol=1e-3, rtol=1e-3)
    assert jnp.allclose(wm_out, ref_wm_bf, atol=1e-3, rtol=1e-3)

    # Loose check vs. full-precision, un-fused two-step reference (semantics).
    ref_logits_f32 = x_flat @ params["wb"] + params["bb"]
    ref_wm_f32 = ref_logits_f32 @ params["wfc"] + params["bfc"]
    assert jnp.allclose(logits, ref_logits_f32, atol=3e-2, rtol=3e-2)
    assert jnp.allclose(wm_out, ref_wm_f32, atol=3e-2, rtol=3e-2)

    # --- exercise the multi-tile (partial tail block) path --------------------
    B2 = 1027  # ragged tail: last grid step is a clipped partial block
    x2 = jax.random.normal(kx2, (B2, C, H, W), jnp.float32)
    logits2 = jax.block_until_ready(
        watermark_forward(x2, prepared, trigger=False, wm_size=wm_size))
    assert logits2.shape == (B2, 10), logits2.shape
    ref2 = (jnp.dot(x2.reshape(B2, -1).astype(jnp.bfloat16),
                    params["wb"].astype(jnp.bfloat16),
                    preferred_element_type=jnp.float32) + params["bb"])
    assert jnp.allclose(logits2, ref2, atol=1e-3, rtol=1e-3)

    print("KERNEL_OK")
</pallas_src>

<mosaic_0001>
module attributes {stable_mosaic.version = 11 : i64} {
  func.func @_linear_kernel(%arg0: i32, %arg1: memref<2x768xf32, #tpu.memory_space<vmem>>, %arg2: memref<768x128xbf16, #tpu.memory_space<vmem>>, %arg3: memref<1x128xf32, #tpu.memory_space<vmem>>, %arg4: memref<2x128xf32, #tpu.memory_space<vmem>>) attributes {dimension_semantics = [#tpu.dimension_semantics<parallel>], iteration_bounds = array<i64: 1>, scalar_prefetch = 0 : i64, scratch_operands = 0 : i64, tpu.core_type = #tpu.core_type<tc>, window_params = [{transform_indices = @transform_0, window_bounds = array<i64: 2, 768>}, {pipeline_mode = #tpu.pipeline_mode<synchronous>, transform_indices = @transform_1, window_bounds = array<i64: 768, 128>}, {pipeline_mode = #tpu.pipeline_mode<synchronous>, transform_indices = @transform_2, window_bounds = array<i64: 1, 128>}, {transform_indices = @transform_3, window_bounds = array<i64: 2, 128>}]} {
    %c0 = arith.constant 0 : index
    %c0_0 = arith.constant 0 : index
    %0 = vector.load %arg1[%c0, %c0_0] : memref<2x768xf32, #tpu.memory_space<vmem>>, vector<2x768xf32>
    %1 = arith.truncf %0 : vector<2x768xf32> to vector<2x768xbf16>
    %c0_1 = arith.constant 0 : index
    %c0_2 = arith.constant 0 : index
    %2 = vector.load %arg2[%c0_1, %c0_2] : memref<768x128xbf16, #tpu.memory_space<vmem>>, vector<768x128xbf16>
    %cst = arith.constant dense<0.000000e+00> : vector<2x128xf32>
    %3 = tpu.matmul %1, %2, %cst {dimension_numbers = #tpu.dot_dimension_numbers<[1], [0], [0], [1], [0, 0, 1, 1], [], []>} : vector<2x768xbf16>, vector<768x128xbf16>, vector<2x128xf32> -> vector<2x128xf32>
    %c0_3 = arith.constant 0 : index
    %c0_4 = arith.constant 0 : index
    %4 = vector.load %arg3[%c0_3, %c0_4] : memref<1x128xf32, #tpu.memory_space<vmem>>, vector<1x128xf32>
    %5 = vector.broadcast %4 : vector<1x128xf32> to vector<2x128xf32>
    %6 = arith.addf %3, %5 : vector<2x128xf32>
    %c0_5 = arith.constant 0 : index
    %c0_6 = arith.constant 0 : index
    %7 = vector.load %arg4[%c0_5, %c0_6] : memref<2x128xf32, #tpu.memory_space<vmem>>, vector<2x128xf32>
    tpu.vector_store %arg4[%c0_5, %c0_6], %6 {strides = array<i32>} : memref<2x128xf32, #tpu.memory_space<vmem>>, vector<2x128xf32>,
    return
  }
  func.func @transform_0(%arg0: i32) -> (i32, i32) {
    %c0_i32 = arith.constant 0 : i32
    %c0_i32_0 = arith.constant 0 : i32
    return %arg0, %c0_i32 : i32, i32
  }
  func.func @transform_1(%arg0: i32) -> (i32, i32) {
    %c0_i32 = arith.constant 0 : i32
    %c0_i32_0 = arith.constant 0 : i32
    %c0_i32_1 = arith.constant 0 : i32
    return %c0_i32, %c0_i32_0 : i32, i32
  }
  func.func @transform_2(%arg0: i32) -> (i32, i32) {
    %c0_i32 = arith.constant 0 : i32
    %c0_i32_0 = arith.constant 0 : i32
    %c0_i32_1 = arith.constant 0 : i32
    return %c0_i32, %c0_i32_0 : i32, i32
  }
  func.func @transform_3(%arg0: i32) -> (i32, i32) {
    %c0_i32 = arith.constant 0 : i32
    %c0_i32_0 = arith.constant 0 : i32
    return %arg0, %c0_i32 : i32, i32
  }
}

</mosaic_0001>

<bundles_post_ra>
// kernel: watermark_forward.1
= control target key start
LH: loop header
LB: loop body
LE: loop exit
PB: predicated region body
PF: predicated region fallthrough
CT: control target
= control target key end

     0   :  { %8 = vsyncpa [#allocation3], 0  ;;  %s874_s0 = inlined_call_operand.vmem [shape: f32[2,768], index: 0, kind: input, shape index: {}]   ;;  %s875_s1 = inlined_call_operand.hbm [shape: bf16[768,128], index: 1, kind: input, shape index: {}]   ;;  %s876_s2 = inlined_call_operand.vmem [shape: f32[1,128], index: 2, kind: input, shape index: {}]   ;;  %s877_s3 = inlined_call_operand.hbm [shape: f32[2,128], index: 3, kind: output, shape index: {}]  }
   0x1   :  { %9 = vsyncpa [#allocation4], 0  ;;  %s816_s12 = smov [#allocation2]   ;;  %s768_s16 = scalar_lea.hbm %s875_s1, 6144 }
   0x2   :  { %s17_s13 = sshll.u32 %s816_s12, 4  ;;  %p769_p0 = scmp.ne.s32.totalorder %s875_s1, %s768_s16  ;;  %s18_s13 = int_to_ptr.vmem [resolvable:$true] %s17_s13 }
   0x3   :  { %p772_p1 = scmp.lt.u32.totalorder %s768_s16, %s875_s1 }
   0x5   :  { %p774_p2 = pnand %p772_p1, %p769_p0 }
   0x7   :  { %777 = shalt.err (!%p774_p2)
}
   0x8   :  { %s778_s21 = scalar_lea.vmem %s18_s13, 6144  ;;  %p783_p4 = scmp.lt.s32.totalorder %s18_s13, %s18_s13 }
   0x9   :  { %p779_p3 = scmp.ne.s32.totalorder %s18_s13, %s778_s21  ;;  %p784_p5 = scmp.lt.s32.totalorder %s778_s21, %s778_s21 }
   0xb   :  { %p785_p6 = por %p784_p5, %p783_p4 }
   0xd   :  { %p786_p7 = pnand %p785_p6, %p779_p3 }
   0xf   :  { %789 = shalt.err (!%p786_p7)
}
  0x10   :  { %s817_s22 = smov 64   ;;  %s818_s23 = smov 4  }
  0x11   :  { %23 = dma.hbm_to_vmem [thread:$0]  %s875_s1, 6144, %s18_s13, [#allocation3], %s817_s22, %s817_s22, %s818_s23  }
  0x12   :  { %812 = dma.done.wait [#allocation3], 6144  }
  0x13   :  { %813 = vsyncadd [#allocation3], 4294961152  ;;  %v719_v0 = vld [vmem:[#allocation2 + $0x40] sm:$0xff]   ;;  %v723_v4 = vld [vmem:[#allocation2 + $0x48] sm:$0xff]   ;;  %v819_v21 = vmov 1983009808   ;;  %v38_v23 = vlaneseq }
  0x14   :  { %v720_v1 = vld [vmem:[#allocation2] sm:$0xff]   ;;  %648 = vmatprep.subr.bf16.mxu0 %v719_v0  ;;  %v724_v5 = vld [vmem:[#allocation2 + $0x8] sm:$0xff]   ;;  %v727_v8 = vld [vmem:[#allocation2 + $0x50] sm:$0xff]   ;;  %v36_v22 = vunpack.c.l.s4 %v819_v21  ;;  %s820_s30 = smov [#allocation5]  }
  0x15   :  { %v721_v2 = vld [vmem:[#allocation2 + $0xc0] sm:$0xff]   ;;  %649 = vmatpush3.bf16.msra.mxu0 %v720_v1  ;;  %v725_v6 = vld [vmem:[#allocation2 + $0xc8] sm:$0xff]   ;;  %v728_v9 = vld [vmem:[#allocation2 + $0x10] sm:$0xff]   ;;  %v39_v29 = vshrl.u32 %v38_v23, 7  ;;  %s589_s4 = sshll.u32 %s820_s30, 4  ;;  %s590_s4 = int_to_ptr.vmem [resolvable:$true] %s589_s4 }
  0x16   :  { %v722_v3 = vld [vmem:[#allocation2 + $0x80] sm:$0xff]   ;;  %670 = vmatprep.subr.bf16.mxu1 %v721_v2  ;;  %650 = vmatprep.subr.bf16.mxu0 %v723_v4  ;;  %v726_v7 = vld [vmem:[#allocation2 + $0x88] sm:$0xff]   ;;  %v729_v10 = vld [vmem:[#allocation2 + $0xd0] sm:$0xff]   ;;  %v37_v28 = vunpack.c.0.s8 %v36_v22  ;;  %p795_p9 = scmp.lt.s32.totalorder %s590_s4, %s590_s4 }
  0x17   :  { %671 = vmatpush3.bf16.msra.mxu1 %v722_v3  ;;  %v730_v11 = vld [vmem:[#allocation2 + $0x90] sm:$0xff]   ;;  %v731_v12 = vld [vmem:[#allocation2 + $0x58] sm:$0xff]   ;;  %v735_v16 = vld [vmem:[#allocation2 + $0x60] sm:$0xff]  }
  0x18   :  { %672 = vmatprep.subr.bf16.mxu1 %v725_v6  ;;  %v732_v13 = vld [vmem:[#allocation2 + $0x18] sm:$0xff]   ;;  %v736_v17 = vld [vmem:[#allocation2 + $0x20] sm:$0xff]   ;;  %v739_v20 = vld [vmem:[#allocation2 + $0x68] sm:$0xff]   ;;  %v40_v34 = vsub.s32 %v37_v28, %v39_v29 }
  0x19   :  { %651 = vmatpush3.bf16.msra.mxu0 %v724_v5  ;;  %v733_v14 = vld [vmem:[#allocation2 + $0xd8] sm:$0xff]   ;;  %v737_v18 = vld [vmem:[#allocation2 + $0xe0] sm:$0xff]   ;;  %v740_v24 = vld [vmem:[#allocation2 + $0x28] sm:$0xff]  }
  0x1a   :  { %652 = vmatprep.subr.bf16.mxu0 %v727_v8  ;;  %v734_v15 = vld [vmem:[#allocation2 + $0x98] sm:$0xff]   ;;  %v738_v19 = vld [vmem:[#allocation2 + $0xa0] sm:$0xff]   ;;  %v741_v25 = vld [vmem:[#allocation2 + $0xe8] sm:$0xff]  }
  0x1b   :  { %673 = vmatpush3.bf16.msra.mxu1 %v726_v7  ;;  %v742_v26 = vld [vmem:[#allocation2 + $0xa8] sm:$0xff]   ;;  %v743_v27 = vld [vmem:[#allocation2 + $0x70] sm:$0xff]   ;;  %v747_v33 = vld [vmem:[#allocation2 + $0x78] sm:$0xff]  }
  0x1c   :  { %674 = vmatprep.subr.bf16.mxu1 %v729_v10  ;;  %v744_v30 = vld [vmem:[#allocation2 + $0x30] sm:$0xff]   ;;  %v748_v35 = vld [vmem:[#allocation2 + $0x38] sm:$0xff]   ;;  %v30_v37 = vld [vmem:[%s874_s0] sm:$0xff] }
  0x1d   :  { %653 = vmatpush3.bf16.msra.mxu0 %v728_v9  ;;  %v745_v31 = vld [vmem:[#allocation2 + $0xf0] sm:$0xff]   ;;  %v749_v36 = vld [vmem:[#allocation2 + $0xf8] sm:$0xff]   ;;  %v41_v38 = vrot.slane %v30_v37, %v40_v34  ;;  %v34_v40 = vcombine.high %v30_v37, %v30_v37  ;;  %v751_v41 = vld [vmem:[#allocation2 + $0x140] sm:$0xff]  }
  0x1e   :  { %654 = vmatprep.subr.bf16.mxu0 %v731_v12  ;;  %v746_v32 = vld [vmem:[#allocation2 + $0xb0] sm:$0xff]   ;;  %v750_v39 = vld [vmem:[#allocation2 + $0xb8] sm:$0xff]   ;;  %v753_v47 = vld [vmem:[#allocation2 + $0x100] sm:$0xff]  }
  0x1f   :  { %675 = vmatpush3.bf16.msra.mxu1 %v730_v11  ;;  %v49_v42 = vcombine.high %v41_v38, %v41_v38  ;;  %v48_v43 = vrot.slane %v34_v40, %v40_v34  ;;  %v65_v44 = vpack.c.bf16 %v41_v38, %v41_v38  ;;  %v754_v49 = vld [vmem:[#allocation2 + $0x148] sm:$0xff]   ;;  %v756_v52 = vld [vmem:[#allocation2 + $0x150] sm:$0xff]   ;;  %v758_v54 = vld [vmem:[#allocation2 + $0x158] sm:$0xff]  }
  0x20   :  { %676 = vmatprep.subr.bf16.mxu1 %v733_v14  ;;  %v755_v51 = vld [vmem:[#allocation2 + $0x108] sm:$0xff]   ;;  %v757_v53 = vld [vmem:[#allocation2 + $0x110] sm:$0xff]   ;;  %v759_v55 = vld [vmem:[#allocation2 + $0x118] sm:$0xff]  }
  0x21   :  { %655 = vmatpush3.bf16.msra.mxu0 %v732_v13  ;;  %v66_v45 = vpack.c.bf16 %v49_v42, %v49_v42  ;;  %v50_v46 = vcombine.high %v48_v43, %v48_v43  ;;  %v67_v48 = vpack.c.bf16 %v48_v43, %v48_v43  ;;  %v598_v56 = vld.sshfl [vmem:[%s874_s0 + $0x8] sm:$0x33 pattern:$0x76325410]  ;;  %v760_v57 = vld [vmem:[#allocation2 + $0x160] sm:$0xff]   ;;  %v764_v63 = vld [vmem:[#allocation2 + $0x170] sm:$0xff]  }
  0x22   :  { %656 = vmatprep.subr.bf16.mxu0 %v735_v16  ;;  %v58_v58 = vcombine.high %v598_v56, %v598_v56  ;;  %v761_v60 = vld [vmem:[#allocation2 + $0x120] sm:$0xff]   ;;  %v762_v61 = vld [vmem:[#allocation2 + $0x168] sm:$0xff]   ;;  %v765_v0 = vld [vmem:[#allocation2 + $0x130] sm:$0xff]   ;;  %v69_v3 = vpack.c.bf16 %v598_v56, %v598_v56 }
  0x23   :  { %677 = vmatpush3.bf16.msra.mxu1 %v734_v15  ;;  %494 = vmatprep.mubr.bf16.mxu0 %v66_v45  ;;  %v68_v50 = vpack.c.bf16 %v50_v46, %v50_v46  ;;  %v763_v62 = vld [vmem:[#allocation2 + $0x128] sm:$0xff]   ;;  %v766_v1 = vld [vmem:[#allocation2 + $0x178] sm:$0xff]   ;;  %v599_v5 = vld [vmem:[%s876_s2] ss:$0 sm:$0xff]  ;;  %s790_s2 = scalar_lea.vmem %s590_s4, 32 }
  0x24   :  { %678 = vmatprep.subr.bf16.mxu1 %v737_v18  ;;  %v70_v59 = vpack.c.bf16 %v58_v58, %v58_v58  ;;  %v767_v2 = vld [vmem:[#allocation2 + $0x138] sm:$0xff]   ;;  %p791_p8 = scmp.ne.s32.totalorder %s590_s4, %s790_s2  ;;  %p796_p10 = scmp.lt.s32.totalorder %s790_s2, %s790_s2 }
  0x25   :  { %657 = vmatpush3.bf16.msra.mxu0 %v736_v17  ;;  %534 = vmatprep.mubr.bf16.mxu1 %v68_v50 }
  0x26   :  { %658 = vmatprep.subr.bf16.mxu0 %v739_v20  ;;  %p797_p11 = por %p796_p10, %p795_p9 }
  0x27   :  { %679 = vmatpush3.bf16.msra.mxu1 %v738_v19 }
  0x28   :  { %680 = vmatprep.subr.bf16.mxu1 %v741_v25  ;;  %p798_p12 = pnand %p797_p11, %p791_p8 }
  0x29   :  { %659 = vmatpush3.bf16.msra.mxu0 %v740_v24 }
  0x2a   :  { %660 = vmatprep.subr.bf16.mxu0 %v743_v27 }
  0x2b   :  { %681 = vmatpush3.bf16.msra.mxu1 %v742_v26 }
  0x2c   :  { %682 = vmatprep.subr.bf16.mxu1 %v745_v31 }
  0x2d   :  { %661 = vmatpush3.bf16.msra.mxu0 %v744_v30 }
  0x2e   :  { %662 = vmatprep.subr.bf16.mxu0 %v747_v33 }
  0x2f   :  { %683 = vmatpush3.bf16.msra.mxu1 %v746_v32 }
  0x30   :  { %684 = vmatprep.subr.bf16.mxu1 %v749_v36 }
  0x31   :  { %663 = vmatpush3.bf16.msra.mxu0 %v748_v35 }
  0x32   :  { %692 = vmatprep.subr.bf16.mxu0 %v751_v41 }
  0x33   :  { %685 = vmatpush3.bf16.msra.mxu1 %v750_v39 }
  0x34   :  { %495 = vmatmul.mubr.bf16.vlgmr.msra.gmra.mrb[0].mxu0 %v65_v44 }
  0x35   :  { %693 = vmatpush3.bf16.msra.mxu0 %v753_v47  ;;  %574 = vmatprep.mubr.bf16.mxu0 %v70_v59 }
  0x36   :  { %535 = vmatmul.mubr.bf16.vlgmr.msra.gmra.mrb[0].mxu1 %v67_v48  ;;  %694 = vmatprep.subr.bf16.mxu0 %v754_v49 }
  0x39   :  { %695 = vmatpush3.bf16.msra.mxu0 %v755_v51 }
  0x3a   :  { %696 = vmatprep.subr.bf16.mxu0 %v756_v52 }
  0x3d   :  { %697 = vmatpush3.bf16.msra.mxu0 %v757_v53 }
  0x3e   :  { %698 = vmatprep.subr.bf16.mxu0 %v758_v54 }
  0x41   :  { %699 = vmatpush3.bf16.msra.mxu0 %v759_v55 }
  0x42   :  { %700 = vmatprep.subr.bf16.mxu0 %v760_v57 }
  0x45   :  { %701 = vmatpush3.bf16.msra.mxu0 %v761_v60 }
  0x46   :  { %702 = vmatprep.subr.bf16.mxu0 %v762_v61 }
  0x49   :  { %703 = vmatpush3.bf16.msra.mxu0 %v763_v62 }
  0x4a   :  { %704 = vmatprep.subr.bf16.mxu0 %v764_v63 }
  0x4d   :  { %705 = vmatpush3.bf16.msra.mxu0 %v765_v0 }
  0x4e   :  { %706 = vmatprep.subr.bf16.mxu0 %v766_v1 }
  0x51   :  { %707 = vmatpush3.bf16.msra.mxu0 %v767_v2 }
  0x54   :  { %575 = vmatmul.mubr.bf16.vlgmr.msra.gmra.mrb[4].mxu0 %v69_v3 }
 0x107   :  { %v664_v4 = vpop.f32.mrb[0].mxu0 }
 0x108   :  { %v665_v6 = vpop.f32.mrb[1].mxu0 }
 0x109   :  { %v666_v7 = vadd.f32 %v665_v6, %v664_v4  ;;  %v667_v8 = vpop.f32.mrb[2].mxu0  ;;  %v686_v9 = vpop.f32.mrb[0].mxu1 }
 0x10a   :  { %v668_v10 = vpop.f32.mrb[3].mxu0  ;;  %v687_v11 = vpop.f32.mrb[1].mxu1 }
 0x10b   :  { %v497_v12 = vadd.f32 %v666_v7, %v599_v5  ;;  %v688_v13 = vadd.f32 %v687_v11, %v686_v9  ;;  %v689_v14 = vpop.f32.mrb[2].mxu1 }
 0x10c   :  { %v690_v15 = vpop.f32.mrb[3].mxu1 }
 0x10d   :  { %v537_v16 = vadd.f32 %v688_v13, %v497_v12 }
 0x127   :  { %v708_v17 = vpop.f32.mrb[4].mxu0 }
 0x128   :  { %v709_v18 = vpop.f32.mrb[5].mxu0 }
 0x129   :  { %v710_v19 = vadd.f32 %v709_v18, %v708_v17  ;;  %v711_v20 = vpop.f32.mrb[6].mxu0 }
 0x12a   :  { %v712_v21 = vpop.f32.mrb[7].mxu0 }
 0x12b   :  { %v577_v22 = vadd.f32 %v710_v19, %v537_v16 }
 0x12d   :  { %582 = vst [vmem:[#allocation5] sm:$0x3] %v577_v22 }
 0x12e   :  { %801 = shalt.err (!%p798_p12)
}
 0x12f   :  { %s802_s7 = scalar_lea.hbm %s877_s3, 32 }
 0x130   :  { %p803_p13 = scmp.ne.s32.totalorder %s877_s3, %s802_s7  ;;  %p806_p0 = scmp.lt.u32.totalorder %s802_s7, %s877_s3 }
 0x132   :  { %p808_p1 = pnand %p806_p0, %p803_p13 }
 0x134   :  { %811 = shalt.err (!%p808_p1)
}
 0x135   :  { %592 = dma.vmem_to_hbm [thread:$0]  %s590_s4, 32, %s877_s3, [#allocation4]  }
 0x136   :  { %814 = dma.done.wait [#allocation4], 32  }
 0x137   :  { %815 = vsyncadd [#allocation4], 4294967264 }
 0x138   :  { %596 = vsyncpa [#allocation3], 1 }
 0x139   :  { %597 = vsyncpa [#allocation4], 1 }

</bundles_post_ra>
